<compile_context>
chip_gen: v7x
topology: tpu7x:2x2x1
jax: 0.10.0
libtpu: 0.0.40
codegen_flags: <defaults>
</compile_context>

<pallas_src>
import functools

import jax
import jax.numpy as jnp
from jax import lax
from jax.experimental import pallas as pl
from jax.experimental.pallas import tpu as pltpu

_EPS = 1e-5


def _round_up(x, m):
    return (x + m - 1) // m * m


def _fused_kernel(x_ref, w1_ref, b1_ref, gamma_ref, beta_ref, w2c_ref, b2_ref,
                  o_ref, sum_ref, sq_ref, w2e_ref, b2e_ref, *, tile_n, n_valid):
    """grid = (phase, batch_tile).  phase 0: BN stats.  phase 1: apply net."""
    p = pl.program_id(0)   # 0 = full-batch statistics pass, 1 = apply pass
    i = pl.program_id(1)   # batch tile index

    # Shared first layer (needed in both phases; recomputing it is cheaper than
    # spilling the (6, N) hidden activations to HBM and reading them back):
    #   h = relu(W1 @ x_tile^T + b1) : (6, TILE_N), batch on lanes.
    h = jnp.einsum("of,nf->on", w1_ref[...], x_ref[...],
                   preferred_element_type=jnp.float32) + b1_ref[...]
    h = jnp.maximum(h, 0.0)

    @pl.when(p == 0)
    def _stats():
        @pl.when(i == 0)
        def _():
            sum_ref[...] = jnp.zeros_like(sum_ref)
            sq_ref[...] = jnp.zeros_like(sq_ref)

        # Mask padded batch columns so they never pollute the batch statistics.
        col = i * tile_n + lax.broadcasted_iota(jnp.int32, h.shape, 1)
        hm = jnp.where(col < n_valid, h, 0.0)
        sum_ref[...] += jnp.sum(hm, axis=1, keepdims=True)       # running sum
        sq_ref[...] += jnp.sum(hm * hm, axis=1, keepdims=True)   # running sum of sq

        # Last stats tile: finalize mean/var and fold BN into Linear(6,1) once.
        @pl.when(i == pl.num_programs(1) - 1)
        def _():
            inv_n = 1.0 / n_valid
            mean = sum_ref[...] * inv_n
            var = jnp.maximum(sq_ref[...] * inv_n - mean * mean, 0.0)  # biased var
            scale = gamma_ref[...] * lax.rsqrt(var + _EPS)             # (6, 1)
            w2e_ref[...] = w2c_ref[...] * scale                        # (6, 1)
            b2e_ref[...] = jnp.sum(
                w2c_ref[...] * (beta_ref[...] - scale * mean),
                axis=0, keepdims=True) + b2_ref[...]                   # (1, 1)

    @pl.when(p == 1)
    def _apply():
        # Second "matmul" as VPU multiply + 6-sublane reduce (no MXU round-trip).
        z = jnp.sum(h * w2e_ref[...], axis=0, keepdims=True) + b2e_ref[...]
        # Sigmoid via EUP exp + approximate EUP reciprocal; (1, TILE_N) lane-dense.
        o_ref[...] = pl.reciprocal(1.0 + jnp.exp(-z), approx=True)


@functools.partial(jax.jit, static_argnames=("tile_n",))
def two_layer_net(x, w1, b1, gamma, beta, w2c, b2, *, tile_n=2048):
    n, f = x.shape
    assert f == 15, "TwoLayerNet expects 15 input features"

    tile = min(tile_n, _round_up(n, 128))        # multiple of 128 -> lane-dense out
    n_pad = _round_up(n, tile)
    num_tiles = n_pad // tile
    x = x.astype(jnp.float32)
    if n_pad != n:
        x = jnp.pad(x, ((0, n_pad - n), (0, 0)))

    small = lambda shape: pl.BlockSpec(shape, lambda p, i: (0, 0))

    out = pl.pallas_call(
        functools.partial(_fused_kernel, tile_n=tile, n_valid=n),
        grid=(2, num_tiles),
        in_specs=[pl.BlockSpec((tile, 15), lambda p, i: (i, 0)),   # x, streamed
                  small((6, 15)), small((6, 1)), small((6, 1)),    # w1, b1, gamma
                  small((6, 1)), small((6, 1)), small((1, 1))],    # beta, w2c, b2
        out_specs=pl.BlockSpec((1, tile), lambda p, i: (0, i)),
        out_shape=jax.ShapeDtypeStruct((1, n_pad), jnp.float32),
        scratch_shapes=[pltpu.VMEM((6, 1), jnp.float32),   # running sum
                        pltpu.VMEM((6, 1), jnp.float32),   # running sum of squares
                        pltpu.VMEM((6, 1), jnp.float32),   # folded w2_eff
                        pltpu.VMEM((1, 1), jnp.float32)],  # folded b2_eff
        compiler_params=pltpu.CompilerParams(
            # Both axes carry state through VMEM scratch (stats across tiles,
            # folded weights across phases) -> must stay sequential.
            dimension_semantics=("arbitrary", "arbitrary"),
            vmem_limit_bytes=64 * 1024 * 1024),
    )(x, w1, b1, gamma, beta, w2c, b2)

    # Lane-dense (1, N_pad) slab -> (N, 1): free metadata reshape + slice.
    return out.reshape(-1)[:n].reshape(n, 1)


def two_layer_net_ref(x, w1, b1, gamma, beta, w2c, b2):
    """Pure-JAX reference mirroring the PyTorch module (training-mode BN)."""
    h = jnp.maximum(x @ w1.T + b1[:, 0], 0.0)
    mean = jnp.mean(h, axis=0)
    var = jnp.mean((h - mean) ** 2, axis=0)
    h_bn = (h - mean) * (gamma[:, 0] / jnp.sqrt(var + _EPS)) + beta[:, 0]
    z = h_bn @ w2c[:, 0] + b2[0, 0]
    return jax.nn.sigmoid(z)[:, None]


def init_params(key):
    """Deterministic init mimicking PyTorch defaults (U(-1/sqrt(fan_in), +))."""
    k1, k2, k3, k4 = jax.random.split(key, 4)
    bound1 = 1.0 / jnp.sqrt(15.0)
    bound2 = 1.0 / jnp.sqrt(6.0)
    w1 = jax.random.uniform(k1, (6, 15), jnp.float32, -bound1, bound1)   # linear1.weight
    b1 = jax.random.uniform(k2, (6, 1), jnp.float32, -bound1, bound1)    # linear1.bias
    gamma = jnp.ones((6, 1), jnp.float32)                                # bn.weight
    beta = jnp.zeros((6, 1), jnp.float32)                                # bn.bias
    w2c = jax.random.uniform(k3, (6, 1), jnp.float32, -bound2, bound2)   # linear2.weight.T
    b2 = jax.random.uniform(k4, (1, 1), jnp.float32, -bound2, bound2)    # linear2.bias
    return w1, b1, gamma, beta, w2c, b2


if __name__ == "__main__":
    key = jax.random.PRNGKey(0)
    k_x, k_p = jax.random.split(key)

    batch = 8
    x = jax.random.normal(k_x, (batch, 15), dtype=jnp.float32)
    params = init_params(k_p)

    out = two_layer_net(x, *params)
    out = jax.block_until_ready(out)

    assert out.shape == (batch, 1)
    assert bool(jnp.all(jnp.isfinite(out)))
    assert bool(jnp.all((out >= 0.0) & (out <= 1.0)))

    ref = two_layer_net_ref(x, *params)
    assert bool(jnp.allclose(out, ref, atol=5e-3)), "mismatch vs pure-JAX reference"

    print("KERNEL_OK")
</pallas_src>

<mosaic_0001>
module attributes {stable_mosaic.version = 11 : i64} {
  func.func @_fused_kernel(%arg0: i32, %arg1: i32, %arg2: memref<128x15xf32, #tpu.memory_space<vmem>>, %arg3: memref<6x15xf32, #tpu.memory_space<vmem>>, %arg4: memref<6x1xf32, #tpu.memory_space<vmem>>, %arg5: memref<6x1xf32, #tpu.memory_space<vmem>>, %arg6: memref<6x1xf32, #tpu.memory_space<vmem>>, %arg7: memref<6x1xf32, #tpu.memory_space<vmem>>, %arg8: memref<1x1xf32, #tpu.memory_space<vmem>>, %arg9: memref<1x128xf32, #tpu.memory_space<vmem>>, %arg10: memref<6x1xf32, #tpu.memory_space<vmem>>, %arg11: memref<6x1xf32, #tpu.memory_space<vmem>>, %arg12: memref<6x1xf32, #tpu.memory_space<vmem>>, %arg13: memref<1x1xf32, #tpu.memory_space<vmem>>) attributes {dimension_semantics = [#tpu.dimension_semantics<arbitrary>, #tpu.dimension_semantics<arbitrary>], iteration_bounds = array<i64: 2, 1>, scalar_prefetch = 0 : i64, scratch_operands = 4 : i64, tpu.core_type = #tpu.core_type<tc>, window_params = [{transform_indices = @transform_0, window_bounds = array<i64: 128, 15>}, {pipeline_mode = #tpu.pipeline_mode<synchronous>, transform_indices = @transform_1, window_bounds = array<i64: 6, 15>}, {pipeline_mode = #tpu.pipeline_mode<synchronous>, transform_indices = @transform_2, window_bounds = array<i64: 6, 1>}, {pipeline_mode = #tpu.pipeline_mode<synchronous>, transform_indices = @transform_3, window_bounds = array<i64: 6, 1>}, {pipeline_mode = #tpu.pipeline_mode<synchronous>, transform_indices = @transform_4, window_bounds = array<i64: 6, 1>}, {pipeline_mode = #tpu.pipeline_mode<synchronous>, transform_indices = @transform_5, window_bounds = array<i64: 6, 1>}, {pipeline_mode = #tpu.pipeline_mode<synchronous>, transform_indices = @transform_6, window_bounds = array<i64: 1, 1>}, {transform_indices = @transform_7, window_bounds = array<i64: 1, 128>}]} {
    %c0 = arith.constant 0 : index
    %c0_0 = arith.constant 0 : index
    %0 = vector.load %arg3[%c0, %c0_0] : memref<6x15xf32, #tpu.memory_space<vmem>>, vector<6x15xf32>
    %c0_1 = arith.constant 0 : index
    %c0_2 = arith.constant 0 : index
    %1 = vector.load %arg2[%c0_1, %c0_2] : memref<128x15xf32, #tpu.memory_space<vmem>>, vector<128x15xf32>
    "tpu.trace_start"() <{level = 10 : i32, message = "of,nf->on"}> : () -> ()
    %cst = arith.constant dense<0.000000e+00> : vector<6x128xf32>
    %2 = tpu.matmul %0, %1, %cst {dimension_numbers = #tpu.dot_dimension_numbers<[1], [1], [0], [0], [0, 0, 1, 0], [], []>} : vector<6x15xf32>, vector<128x15xf32>, vector<6x128xf32> -> vector<6x128xf32>
    "tpu.trace_stop"() : () -> ()
    %c0_3 = arith.constant 0 : index
    %c0_4 = arith.constant 0 : index
    %3 = vector.load %arg4[%c0_3, %c0_4] : memref<6x1xf32, #tpu.memory_space<vmem>>, vector<6x1xf32>
    %4 = vector.broadcast %3 : vector<6x1xf32> to vector<6x128xf32>
    %5 = arith.addf %2, %4 : vector<6x128xf32>
    %cst_5 = arith.constant 0.000000e+00 : f32
    %6 = vector.broadcast %cst_5 : f32 to vector<6x128xf32>
    %7 = arith.maximumf %5, %6 : vector<6x128xf32>
    %c0_i32 = arith.constant 0 : i32
    %8 = arith.cmpi eq, %arg0, %c0_i32 : i32
    %9 = arith.extui %8 : i1 to i32
    %c0_i32_6 = arith.constant 0 : i32
    %10 = arith.cmpi ne, %9, %c0_i32_6 : i32
    scf.if %10 {
      %c0_i32_8 = arith.constant 0 : i32
      %14 = arith.cmpi eq, %arg1, %c0_i32_8 : i32
      %15 = arith.extui %14 : i1 to i32
      %c0_i32_9 = arith.constant 0 : i32
      %16 = arith.cmpi ne, %15, %c0_i32_9 : i32
      scf.if %16 {
        %cst_23 = arith.constant 0.000000e+00 : f32
        %39 = vector.broadcast %cst_23 : f32 to vector<6x1xf32>
        %c0_24 = arith.constant 0 : index
        %c0_25 = arith.constant 0 : index
        %40 = vector.load %arg10[%c0_24, %c0_25] : memref<6x1xf32, #tpu.memory_space<vmem>>, vector<6x1xf32>
        tpu.vector_store %arg10[%c0_24, %c0_25], %39 {strides = array<i32>} : memref<6x1xf32, #tpu.memory_space<vmem>>, vector<6x1xf32>,
        %cst_26 = arith.constant 0.000000e+00 : f32
        %41 = vector.broadcast %cst_26 : f32 to vector<6x1xf32>
        %c0_27 = arith.constant 0 : index
        %c0_28 = arith.constant 0 : index
        %42 = vector.load %arg11[%c0_27, %c0_28] : memref<6x1xf32, #tpu.memory_space<vmem>>, vector<6x1xf32>
        tpu.vector_store %arg11[%c0_27, %c0_28], %41 {strides = array<i32>} : memref<6x1xf32, #tpu.memory_space<vmem>>, vector<6x1xf32>,
      } else {
      }
      %c128_i32 = arith.constant 128 : i32
      %17 = arith.muli %arg1, %c128_i32 : i32
      %18 = tpu.iota {dimensions = array<i32: 1>} : vector<6x128xi32>
      %19 = vector.broadcast %17 : i32 to vector<6x128xi32>
      %20 = arith.addi %19, %18 : vector<6x128xi32>
      %c8_i32 = arith.constant 8 : i32
      %21 = vector.broadcast %c8_i32 : i32 to vector<6x128xi32>
      %22 = arith.cmpi slt, %20, %21 : vector<6x128xi32>
      %cst_10 = arith.constant 0.000000e+00 : f32
      %23 = vector.broadcast %cst_10 : f32 to vector<6x128xf32>
      %24 = arith.select %22, %7, %23 : vector<6x128xi1>, vector<6x128xf32>
      %c0_11 = arith.constant 0 : index
      %c0_12 = arith.constant 0 : index
      %25 = vector.load %arg10[%c0_11, %c0_12] : memref<6x1xf32, #tpu.memory_space<vmem>>, vector<6x1xf32>
      %cst_13 = arith.constant dense<0.000000e+00> : vector<6xf32>
      %26 = vector.multi_reduction <add>, %24, %cst_13 [1] : vector<6x128xf32> to vector<6xf32>
      %27 = vector.shape_cast %26 : vector<6xf32> to vector<6x1xf32>
      %28 = arith.addf %25, %27 : vector<6x1xf32>
      %c0_14 = arith.constant 0 : index
      %c0_15 = arith.constant 0 : index
      %29 = vector.load %arg10[%c0_14, %c0_15] : memref<6x1xf32, #tpu.memory_space<vmem>>, vector<6x1xf32>
      tpu.vector_store %arg10[%c0_14, %c0_15], %28 {strides = array<i32>} : memref<6x1xf32, #tpu.memory_space<vmem>>, vector<6x1xf32>,
      %c0_16 = arith.constant 0 : index
      %c0_17 = arith.constant 0 : index
      %30 = vector.load %arg11[%c0_16, %c0_17] : memref<6x1xf32, #tpu.memory_space<vmem>>, vector<6x1xf32>
      %31 = arith.mulf %24, %24 : vector<6x128xf32>
      %cst_18 = arith.constant dense<0.000000e+00> : vector<6xf32>
      %32 = vector.multi_reduction <add>, %31, %cst_18 [1] : vector<6x128xf32> to vector<6xf32>
      %33 = vector.shape_cast %32 : vector<6xf32> to vector<6x1xf32>
      %34 = arith.addf %30, %33 : vector<6x1xf32>
      %c0_19 = arith.constant 0 : index
      %c0_20 = arith.constant 0 : index
      %35 = vector.load %arg11[%c0_19, %c0_20] : memref<6x1xf32, #tpu.memory_space<vmem>>, vector<6x1xf32>
      tpu.vector_store %arg11[%c0_19, %c0_20], %34 {strides = array<i32>} : memref<6x1xf32, #tpu.memory_space<vmem>>, vector<6x1xf32>,
      %c0_i32_21 = arith.constant 0 : i32
      %36 = arith.cmpi eq, %arg1, %c0_i32_21 : i32
      %37 = arith.extui %36 : i1 to i32
      %c0_i32_22 = arith.constant 0 : i32
      %38 = arith.cmpi ne, %37, %c0_i32_22 : i32
      scf.if %38 {
        %c0_23 = arith.constant 0 : index
        %c0_24 = arith.constant 0 : index
        %39 = vector.load %arg10[%c0_23, %c0_24] : memref<6x1xf32, #tpu.memory_space<vmem>>, vector<6x1xf32>
        %cst_25 = arith.constant 1.250000e-01 : f32
        %40 = vector.broadcast %cst_25 : f32 to vector<6x1xf32>
        %41 = arith.mulf %39, %40 : vector<6x1xf32>
        %c0_26 = arith.constant 0 : index
        %c0_27 = arith.constant 0 : index
        %42 = vector.load %arg11[%c0_26, %c0_27] : memref<6x1xf32, #tpu.memory_space<vmem>>, vector<6x1xf32>
        %cst_28 = arith.constant 1.250000e-01 : f32
        %43 = vector.broadcast %cst_28 : f32 to vector<6x1xf32>
        %44 = arith.mulf %42, %43 : vector<6x1xf32>
        %45 = arith.mulf %41, %41 : vector<6x1xf32>
        %46 = arith.subf %44, %45 : vector<6x1xf32>
        %cst_29 = arith.constant 0.000000e+00 : f32
        %47 = vector.broadcast %cst_29 : f32 to vector<6x1xf32>
        %48 = arith.maximumf %46, %47 : vector<6x1xf32>
        %c0_30 = arith.constant 0 : index
        %c0_31 = arith.constant 0 : index
        %49 = vector.load %arg5[%c0_30, %c0_31] : memref<6x1xf32, #tpu.memory_space<vmem>>, vector<6x1xf32>
        %cst_32 = arith.constant 9.99999974E-6 : f32
        %50 = vector.broadcast %cst_32 : f32 to vector<6x1xf32>
        %51 = arith.addf %48, %50 : vector<6x1xf32>
        %52 = math.rsqrt %51 : vector<6x1xf32>
        %53 = arith.mulf %49, %52 : vector<6x1xf32>
        %c0_33 = arith.constant 0 : index
        %c0_34 = arith.constant 0 : index
        %54 = vector.load %arg7[%c0_33, %c0_34] : memref<6x1xf32, #tpu.memory_space<vmem>>, vector<6x1xf32>
        %55 = arith.mulf %54, %53 : vector<6x1xf32>
        %c0_35 = arith.constant 0 : index
        %c0_36 = arith.constant 0 : index
        %56 = vector.load %arg12[%c0_35, %c0_36] : memref<6x1xf32, #tpu.memory_space<vmem>>, vector<6x1xf32>
        tpu.vector_store %arg12[%c0_35, %c0_36], %55 {strides = array<i32>} : memref<6x1xf32, #tpu.memory_space<vmem>>, vector<6x1xf32>,
        %c0_37 = arith.constant 0 : index
        %c0_38 = arith.constant 0 : index
        %57 = vector.load %arg7[%c0_37, %c0_38] : memref<6x1xf32, #tpu.memory_space<vmem>>, vector<6x1xf32>
        %c0_39 = arith.constant 0 : index
        %c0_40 = arith.constant 0 : index
        %58 = vector.load %arg6[%c0_39, %c0_40] : memref<6x1xf32, #tpu.memory_space<vmem>>, vector<6x1xf32>
        %59 = arith.mulf %53, %41 : vector<6x1xf32>
        %60 = arith.subf %58, %59 : vector<6x1xf32>
        %61 = arith.mulf %57, %60 : vector<6x1xf32>
        %cst_41 = arith.constant dense<0.000000e+00> : vector<1xf32>
        %62 = vector.multi_reduction <add>, %61, %cst_41 [0] : vector<6x1xf32> to vector<1xf32>
        %63 = vector.shape_cast %62 : vector<1xf32> to vector<1x1xf32>
        %c0_42 = arith.constant 0 : index
        %c0_43 = arith.constant 0 : index
        %64 = vector.load %arg8[%c0_42, %c0_43] : memref<1x1xf32, #tpu.memory_space<vmem>>, vector<1x1xf32>
        %65 = arith.addf %63, %64 : vector<1x1xf32>
        %c0_44 = arith.constant 0 : index
        %c0_45 = arith.constant 0 : index
        %66 = vector.load %arg13[%c0_44, %c0_45] : memref<1x1xf32, #tpu.memory_space<vmem>>, vector<1x1xf32>
        tpu.vector_store %arg13[%c0_44, %c0_45], %65 {strides = array<i32>} : memref<1x1xf32, #tpu.memory_space<vmem>>, vector<1x1xf32>,
      } else {
      }
    } else {
    }
    %c1_i32 = arith.constant 1 : i32
    %11 = arith.cmpi eq, %arg0, %c1_i32 : i32
    %12 = arith.extui %11 : i1 to i32
    %c0_i32_7 = arith.constant 0 : i32
    %13 = arith.cmpi ne, %12, %c0_i32_7 : i32
    scf.if %13 {
      %c0_8 = arith.constant 0 : index
      %c0_9 = arith.constant 0 : index
      %14 = vector.load %arg12[%c0_8, %c0_9] : memref<6x1xf32, #tpu.memory_space<vmem>>, vector<6x1xf32>
      %15 = vector.broadcast %14 : vector<6x1xf32> to vector<6x128xf32>
      %16 = arith.mulf %7, %15 : vector<6x128xf32>
      %cst_10 = arith.constant dense<0.000000e+00> : vector<128xf32>
      %17 = vector.multi_reduction <add>, %16, %cst_10 [0] : vector<6x128xf32> to vector<128xf32>
      %18 = vector.shape_cast %17 : vector<128xf32> to vector<1x128xf32>
      %c0_11 = arith.constant 0 : index
      %c0_12 = arith.constant 0 : index
      %19 = vector.load %arg13[%c0_11, %c0_12] : memref<1x1xf32, #tpu.memory_space<vmem>>, vector<1x1xf32>
      %20 = vector.broadcast %19 : vector<1x1xf32> to vector<1x128xf32>
      %21 = arith.addf %18, %20 : vector<1x128xf32>
      %cst_13 = arith.constant 0.000000e+00 : f32
      %22 = vector.broadcast %cst_13 : f32 to vector<1x128xf32>
      %23 = arith.subf %22, %21 : vector<1x128xf32>
      %24 = math.exp %23 : vector<1x128xf32>
      %cst_14 = arith.constant 1.000000e+00 : f32
      %25 = vector.broadcast %cst_14 : f32 to vector<1x128xf32>
      %26 = arith.addf %25, %24 : vector<1x128xf32>
      %27 = tpu.reciprocal %26 {approx = true} : vector<1x128xf32> -> vector<1x128xf32>
      %c0_15 = arith.constant 0 : index
      %c0_16 = arith.constant 0 : index
      %28 = vector.load %arg9[%c0_15, %c0_16] : memref<1x128xf32, #tpu.memory_space<vmem>>, vector<1x128xf32>
      tpu.vector_store %arg9[%c0_15, %c0_16], %27 {strides = array<i32>} : memref<1x128xf32, #tpu.memory_space<vmem>>, vector<1x128xf32>,
    } else {
    }
    return
  }
  func.func @transform_0(%arg0: i32, %arg1: i32) -> (i32, i32) {
    %c0_i32 = arith.constant 0 : i32
    %c0_i32_0 = arith.constant 0 : i32
    return %arg1, %c0_i32 : i32, i32
  }
  func.func @transform_1(%arg0: i32, %arg1: i32) -> (i32, i32) {
    %c0_i32 = arith.constant 0 : i32
    %c0_i32_0 = arith.constant 0 : i32
    %c0_i32_1 = arith.constant 0 : i32
    return %c0_i32, %c0_i32_0 : i32, i32
  }
  func.func @transform_2(%arg0: i32, %arg1: i32) -> (i32, i32) {
    %c0_i32 = arith.constant 0 : i32
    %c0_i32_0 = arith.constant 0 : i32
    %c0_i32_1 = arith.constant 0 : i32
    return %c0_i32, %c0_i32_0 : i32, i32
  }
  func.func @transform_3(%arg0: i32, %arg1: i32) -> (i32, i32) {
    %c0_i32 = arith.constant 0 : i32
    %c0_i32_0 = arith.constant 0 : i32
    %c0_i32_1 = arith.constant 0 : i32
    return %c0_i32, %c0_i32_0 : i32, i32
  }
  func.func @transform_4(%arg0: i32, %arg1: i32) -> (i32, i32) {
    %c0_i32 = arith.constant 0 : i32
    %c0_i32_0 = arith.constant 0 : i32
    %c0_i32_1 = arith.constant 0 : i32
    return %c0_i32, %c0_i32_0 : i32, i32
  }
  func.func @transform_5(%arg0: i32, %arg1: i32) -> (i32, i32) {
    %c0_i32 = arith.constant 0 : i32
    %c0_i32_0 = arith.constant 0 : i32
    %c0_i32_1 = arith.constant 0 : i32
    return %c0_i32, %c0_i32_0 : i32, i32
  }
  func.func @transform_6(%arg0: i32, %arg1: i32) -> (i32, i32) {
    %c0_i32 = arith.constant 0 : i32
    %c0_i32_0 = arith.constant 0 : i32
    %c0_i32_1 = arith.constant 0 : i32
    return %c0_i32, %c0_i32_0 : i32, i32
  }
  func.func @transform_7(%arg0: i32, %arg1: i32) -> (i32, i32) {
    %c0_i32 = arith.constant 0 : i32
    %c0_i32_0 = arith.constant 0 : i32
    return %c0_i32, %arg1 : i32, i32
  }
}

</mosaic_0001>

<bundles_post_ra>
// kernel: two_layer_net.1
= control target key start
LH: loop header
LB: loop body
LE: loop exit
PB: predicated region body
PF: predicated region fallthrough
CT: control target
= control target key end

     0   :  { %s1504_s0 = inlined_call_operand.hbm [shape: f32[128,15], index: 0, kind: input, shape index: {}]   ;;  %s1505_s1 = inlined_call_operand.hbm [shape: f32[6,15], index: 1, kind: input, shape index: {}]   ;;  %s1506_s2 = inlined_call_operand.hbm [shape: f32[6,1], index: 2, kind: input, shape index: {}]   ;;  %s1507_s3 = inlined_call_operand.hbm [shape: f32[6,1], index: 3, kind: input, shape index: {}]   ;;  %s1508_s4 = inlined_call_operand.hbm [shape: f32[6,1], index: 4, kind: input, shape index: {}]   ;;  %s1509_s5 = inlined_call_operand.hbm [shape: f32[6,1], index: 5, kind: input, shape index: {}]   ;;  %s1510_s6 = inlined_call_operand.<no memory space> [shape: f32[1,1], index: 6, kind: input, shape index: {}]   ;;  %s1511_s7 = inlined_call_operand.hbm [shape: f32[1,128], index: 7, kind: output, shape index: {}]  }
   0x1   :  { %v12_v0 = vstv %s1510_s6 }
   0x2   :  { %13 = vst [vmem:[#allocation6] sm:$0x1] %v12_v0 }
   0x3   :  { %14 = vsyncpa [#allocation8], 0 }
   0x4   :  { %15 = vsyncpa [#allocation11], 0 }
   0x5   :  { %16 = vsyncpa [#allocation14], 0 }
   0x6   :  { %17 = vsyncpa [#allocation17], 0 }
   0x7   :  { %18 = vsyncpa [#allocation9], 0  ;;  %s1234_s26 = smov 0   ;;  %s1236_s27 = smov 0  }
   0x8   :  { %s1238_s28 = smov 0  }
   0x9 LB: > { %s1176_s6 = smov [#allocation10]   ;;  %s708_s30 = sadd.s32 4294967295, %s1174_s28   ;;  %s1174_s28 = sphi %s1238_s28, %s24_s28   ;;  %s1170_s27 = sphi %s1236_s27, %s1527_s27   ;;  %s1166_s26 = sphi %s1234_s26, %s1526_s26  }
   0xa   : > { %s248_s29 = sshll.u32 %s1176_s6, 4  ;;  %p709_p0 = scmp.ge.s32.totalorder %s1174_s28, 1  ;;  %s249_s29 = int_to_ptr.vmem [resolvable:$true] %s248_s29 }
   0xb   : > { %p219_p1 = scmp.lt.s32.totalorder %s1174_s28, 3  ;;  %p1254_p2 = scmp.eq.s32.totalorder %s708_s30, 0 }
   0xc   : > { %s1177_s10 = smov [#allocation13]   ;;  %s36_s13 = sadd.s32 1, %s1170_s27 }
   0xd   : > { %s1515_s8 = scalar_select %p1254_p2, 1, 0 }
   0xe   : > { %p1258_p3 = pnand %p709_p0, %p219_p1  ;;  %s270_s11 = sshll.u32 %s1177_s10, 4  ;;  %s1264_s11 = int_to_ptr.vmem [resolvable:$true] %s270_s11 }
   0xf   : > { %p1275_p6 = scmp.ge.s32.totalorder %s36_s13, 2  ;;  %s938_s17 = scalar_lea.hbm %s1505_s1, 128 }
  0x10   : > { %s1516_s9 = scalar_select %p1258_p3, 1, 0 }
  0x11   : > { %p858_p4 = pneg %p1258_p3  ;;  %p939_p7 = scmp.ne.s32.totalorder %s1505_s1, %s938_s17 }
  0x12   : > { %s1518_s14 = scalar_select %p1275_p6, 1, 0 }
  0x13   : > { %p1268_p5 = pnand %p1254_p2, %p858_p4  ;;  %p945_p11 = scmp.lt.u32.totalorder %s938_s17, %s1505_s1 }
  0x15   : > { %p1287_p8 = pneg %p1268_p5 }
  0x17   : > { %p941_p9 = pnand %p1287_p8, %p939_p7 }
  0x19   : > { %p942_p10 = pneg %p941_p9 }
  0x1b   : > { %p947_p12 = pnand %p945_p11, %p942_p10 }
  0x1d   : > { %950 = shalt.err (!%p947_p12)
}
  0x1e   : > { %s951_s23 = scalar_lea.vmem %s249_s29, 128  ;;  %p959_p4 = scmp.lt.s32.totalorder %s249_s29, %s249_s29 }
  0x1f   : > { %p952_p13 = scmp.ne.s32.totalorder %s249_s29, %s951_s23  ;;  %p960_p2 = scmp.lt.s32.totalorder %s951_s23, %s951_s23 }
  0x21   : > { %p954_p0 = pnand %p952_p13, %p1287_p8  ;;  %p961_p3 = por %p960_p2, %p959_p4 }
  0x23   : > { %p955_p1 = pneg %p954_p0 }
  0x25   : > { %p962_p6 = pnand %p961_p3, %p955_p1 }
  0x27   : > { %965 = shalt.err (!%p962_p6)
}
  0x28   : > { %864 = dma.hbm_to_vmem [thread:$0]  (!%p1268_p5), %s1505_s1, 128, %s249_s29, [#allocation11]  }
  0x29   : > { %s966_s15 = scalar_lea.hbm %s1507_s3, 128 }
  0x2a   : > { %p967_p7 = scmp.ne.s32.totalorder %s1507_s3, %s966_s15  ;;  %p973_p3 = scmp.lt.u32.totalorder %s966_s15, %s1507_s3 }
  0x2c   : > { %p969_p9 = pnand %p967_p7, %p1287_p8 }
  0x2e   : > { %p970_p2 = pneg %p969_p9 }
  0x30   : > { %p975_p6 = pnand %p973_p3, %p970_p2 }
  0x32   : > { %978 = shalt.err (!%p975_p6)
}
  0x33   : > { %s979_s29 = scalar_lea.vmem %s1264_s11, 128  ;;  %p987_p13 = scmp.lt.s32.totalorder %s1264_s11, %s1264_s11 }
  0x34   : > { %p980_p10 = scmp.ne.s32.totalorder %s1264_s11, %s979_s29  ;;  %p988_p0 = scmp.lt.s32.totalorder %s979_s29, %s979_s29 }
  0x36   : > { %p982_p11 = pnand %p980_p10, %p1287_p8  ;;  %p989_p1 = por %p988_p0, %p987_p13 }
  0x38   : > { %p983_p12 = pneg %p982_p11 }
  0x3a   : > { %p990_p4 = pnand %p989_p1, %p983_p12 }
  0x3c   : > { %993 = shalt.err (!%p990_p4)
}
  0x3d   : > { %870 = dma.hbm_to_vmem [thread:$0]  (!%p1268_p5), %s1507_s3, 128, %s1264_s11, [#allocation14]  }
  0x3e   : > { %p1520_p7 = scmp.ne.s32.totalorder %s1518_s14, 0  ;;  %s1178_s23 = smov [#allocation7]  }
  0x3f   : > { %s234_s24 = sshll.u32 %s1178_s23, 4  ;;  %s994_s10 = scalar_lea.hbm %s1504_s0, 2048  ;;  %s235_s24 = int_to_ptr.vmem [resolvable:$true] %s234_s24 }
  0x40   : > { %s1529_s13 = smov (%p1520_p7, %s36_s13), 0  ;;  %p995_p9 = scmp.ne.s32.totalorder %s1504_s0, %s994_s10 }
  0x41   : > { %p1001_p6 = scmp.lt.u32.totalorder %s994_s10, %s1504_s0 }
  0x42   : > { %p997_p2 = pnand %p995_p9, %p1287_p8 }
  0x44   : > { %p998_p3 = pneg %p997_p2 }
  0x46   : > { %p1003_p10 = pnand %p1001_p6, %p998_p3 }
  0x48   : > { %1006 = shalt.err (!%p1003_p10)
}
  0x49   : > { %s1007_s14 = scalar_lea.vmem %s235_s24, 2048  ;;  %p1015_p0 = scmp.lt.s32.totalorder %s235_s24, %s235_s24 }
  0x4a   : > { %p1008_p11 = scmp.ne.s32.totalorder %s235_s24, %s1007_s14  ;;  %p1016_p1 = scmp.lt.s32.totalorder %s1007_s14, %s1007_s14 }
  0x4c   : > { %p1010_p12 = pnand %p1008_p11, %p1287_p8  ;;  %p1017_p4 = por %p1016_p1, %p1015_p0 }
  0x4e   : > { %p1011_p13 = pneg %p1010_p12 }
  0x50   : > { %p1018_p7 = pnand %p1017_p4, %p1011_p13 }
  0x52   : > { %1021 = shalt.err (!%p1018_p7)
}
  0x53   : > { %s1179_s18 = smov 128   ;;  %s1180_s19 = smov 8  }
  0x54   : > { %861 = dma.hbm_to_vmem [thread:$0]  (!%p1268_p5), %s1504_s0, 2048, %s235_s24, [#allocation8], %s1179_s18, %s1179_s18, %s1180_s19  }
  0x55   : > { %s1181_s22 = smov [#allocation12]   ;;  %s1182_s25 = smov [#allocation15]  }
  0x56   : > { %s259_s23 = sshll.u32 %s1181_s22, 4  ;;  %s281_s6 = sshll.u32 %s1182_s25, 4  ;;  %s260_s23 = int_to_ptr.vmem [resolvable:$true] %s259_s23  ;;  %s1350_s6 = int_to_ptr.vmem [resolvable:$true] %s281_s6 }
  0x57   : > { %s1022_s16 = scalar_lea.hbm %s1506_s2, 128 }
  0x58   : > { %p1023_p9 = scmp.ne.s32.totalorder %s1506_s2, %s1022_s16  ;;  %p1029_p6 = scmp.lt.u32.totalorder %s1022_s16, %s1506_s2 }
  0x5a   : > { %p1025_p2 = pnand %p1023_p9, %p1287_p8 }
  0x5c   : > { %p1026_p3 = pneg %p1025_p2 }
  0x5e   : > { %p1031_p10 = pnand %p1029_p6, %p1026_p3 }
  0x60   : > { %1034 = shalt.err (!%p1031_p10)
}
  0x61   : > { %s1035_s18 = scalar_lea.vmem %s260_s23, 128  ;;  %p1043_p0 = scmp.lt.s32.totalorder %s260_s23, %s260_s23 }
  0x62   : > { %p1036_p11 = scmp.ne.s32.totalorder %s260_s23, %s1035_s18  ;;  %p1044_p1 = scmp.lt.s32.totalorder %s1035_s18, %s1035_s18 }
  0x64   : > { %p1038_p12 = pnand %p1036_p11, %p1287_p8  ;;  %p1045_p4 = por %p1044_p1, %p1043_p0 }
  0x66   : > { %p1039_p13 = pneg %p1038_p12 }
  0x68   : > { %p1046_p7 = pnand %p1045_p4, %p1039_p13 }
  0x6a   : > { %1049 = shalt.err (!%p1046_p7)
}
  0x6b   : > { %867 = dma.hbm_to_vmem [thread:$0]  (!%p1268_p5), %s1506_s2, 128, %s260_s23, [#allocation11]  }
  0x6c   : > { %s1050_s25 = scalar_lea.hbm %s1508_s4, 128 }
  0x6d   : > { %p1051_p9 = scmp.ne.s32.totalorder %s1508_s4, %s1050_s25  ;;  %p1057_p6 = scmp.lt.u32.totalorder %s1050_s25, %s1508_s4 }
  0x6f   : > { %p1053_p2 = pnand %p1051_p9, %p1287_p8 }
  0x71   : > { %p1054_p3 = pneg %p1053_p2 }
  0x73   : > { %p1059_p10 = pnand %p1057_p6, %p1054_p3 }
  0x75   : > { %1062 = shalt.err (!%p1059_p10)
}
  0x76   : > { %s1063_s23 = scalar_lea.vmem %s1350_s6, 128  ;;  %p1071_p0 = scmp.lt.s32.totalorder %s1350_s6, %s1350_s6 }
  0x77   : > { %p1064_p11 = scmp.ne.s32.totalorder %s1350_s6, %s1063_s23  ;;  %p1072_p1 = scmp.lt.s32.totalorder %s1063_s23, %s1063_s23 }
  0x79   : > { %p1066_p12 = pnand %p1064_p11, %p1287_p8  ;;  %p1073_p4 = por %p1072_p1, %p1071_p0 }
  0x7b   : > { %p1067_p13 = pneg %p1066_p12 }
  0x7d   : > { %p1074_p7 = pnand %p1073_p4, %p1067_p13 }
  0x7f   : > { %1077 = shalt.err (!%p1074_p7)
}
  0x80   : > { %873 = dma.hbm_to_vmem [thread:$0]  (!%p1268_p5), %s1508_s4, 128, %s1350_s6, [#allocation14]  }
  0x81   : > { %s1183_s24 = smov [#allocation16]   ;;  %s1078_s21 = scalar_lea.hbm %s1509_s5, 128 }
  0x82   : > { %s292_s18 = sshll.u32 %s1183_s24, 4  ;;  %p1079_p9 = scmp.ne.s32.totalorder %s1509_s5, %s1078_s21  ;;  %s293_s18 = int_to_ptr.vmem [resolvable:$true] %s292_s18 }
  0x83   : > { %p1085_p6 = scmp.lt.u32.totalorder %s1078_s21, %s1509_s5 }
  0x84   : > { %p1081_p2 = pnand %p1079_p9, %p1287_p8 }
  0x86   : > { %p1082_p3 = pneg %p1081_p2 }
  0x88   : > { %p1087_p10 = pnand %p1085_p6, %p1082_p3 }
  0x8a   : > { %1090 = shalt.err (!%p1087_p10)
}
  0x8b   : > { %s1091_s6 = scalar_lea.vmem %s293_s18, 128  ;;  %p1099_p0 = scmp.lt.s32.totalorder %s293_s18, %s293_s18 }
  0x8c   : > { %p1092_p11 = scmp.ne.s32.totalorder %s293_s18, %s1091_s6  ;;  %p1100_p1 = scmp.lt.s32.totalorder %s1091_s6, %s1091_s6 }
  0x8e   : > { %p1094_p12 = pnand %p1092_p11, %p1287_p8  ;;  %p1101_p4 = por %p1100_p1, %p1099_p0 }
  0x90   : > { %p1095_p13 = pneg %p1094_p12 }
  0x92   : > { %p1102_p7 = pnand %p1101_p4, %p1095_p13 }
  0x94   : > { %1105 = shalt.err (!%p1102_p7)
}
  0x95   : > { %876 = dma.hbm_to_vmem [thread:$0]  (!%p1268_p5), %s1509_s5, 128, %s293_s18, [#allocation17]  }
  0x96   : > { %p1521_p9 = scmp.ne.s32.totalorder %s1516_s9, 0 }
  0x97   : > { %p1522_p2 = scmp.ne.s32.totalorder (!%p1521_p9), %s1515_s8, 0 }
  0x98   : > { %308 = sbr.rel (%p1521_p9) target bundleno = 852 (0x354), region = 48 }
  0x9f   : > { %1145 = dma.done.wait (%p1522_p2), [#allocation8], 2048  }
  0xa0   : > { %1147 = vsyncadd (%p1522_p2), [#allocation8], 4294965248 }
  0xa1   : > { %1149 = dma.done.wait (%p1522_p2), [#allocation11], 256  }
  0xa2   : > { %1151 = vsyncadd (%p1522_p2), [#allocation11], 4294967040 }
  0xa3   : > { %1153 = dma.done.wait (%p1522_p2), [#allocation14], 256  }
  0xa4   : > { %1155 = vsyncadd (%p1522_p2), [#allocation14], 4294967040 }
  0xa5   : > { %1157 = dma.done.wait (%p1522_p2), [#allocation17], 128  }
  0xa6   : > { %1159 = vsyncadd (%p1522_p2), [#allocation17], 4294967168  ;;  %v1184_v1 = vmov 0.0|0.0   ;;  %vm1185_vm0 = vmmov 0   ;;  %v1186_v2 = vmov 0.0   ;;  %v1187_v3 = vmov 0  }
  0xa7   : > { %798 = vmatprep.subr.bf16.mxu0 %v1184_v1  ;;  %795 = vmatprep.mubr.msk.f32.mxu0 %vm1185_vm0, %v1186_v2  ;;  %vm374_vm1 = vcmask 121856   ;;  %v352_v4 = vld [vmem:[#allocation7] sm:$0xff]  ;;  %v353_v5 = vld [vmem:[#allocation7 + $0x8] sm:$0xff]  ;;  %v354_v8 = vld [vmem:[#allocation7 + $0x10] sm:$0xff]  ;;  %p740_p5 = scmp.ne.s32.totalorder %s1166_s26, 0 }
  0xa8   : > { %930 = vset.pattern.permute.xlu0 %v1187_v3  ;;  %vm1431_vm2 = vmpackc.low %vm374_vm1, %vm374_vm1  ;;  %v799_v7 = vpack.c.bf16 %v353_v5, %v352_v4  ;;  %v355_v9 = vld [vmem:[#allocation7 + $0x18] sm:$0xff]  ;;  %v368_v10 = vld [vmem:[#allocation12] sm:$0x3f]  ;;  %v509_v36 = vlaneseq (!%p740_p5)  ;;  %vm516_vm3 = vcmask (!%p740_p5), 1045504   ;;  %vm505_vm5 = vcmask (!%p740_p5), 5120  }
  0xa9   : > { %371 = vperm.xlu0 %930, %v368_v10   ;;  %v803_v11 = vpack.c.bf16 %v355_v9, %v354_v8  ;;  %v356_v12 = vld [vmem:[#allocation7 + $0x20] sm:$0xff]  ;;  %v357_v13 = vld [vmem:[#allocation7 + $0x28] sm:$0xff]  ;;  %v358_v15 = vld [vmem:[#allocation7 + $0x30] sm:$0xff]  ;;  %v1188_v42 = vmov (!%p740_p5), 0.0   ;;  %vm561_vm6 = vcmask (!%p740_p5), 0  }
  0xaa   : > { %801 = vmatpush3.bf16.xpose.msk.msra.mxu0 %vm1431_vm2, %v799_v7  ;;  %v807_v14 = vpack.c.bf16 %v357_v13, %v356_v12  ;;  %v359_v16 = vld [vmem:[#allocation7 + $0x38] sm:$0xff]  ;;  %v360_v18 = vld [vmem:[#allocation7 + $0x40] sm:$0xff]  ;;  %v361_v19 = vld [vmem:[#allocation7 + $0x48] sm:$0xff]  ;;  %v510_v37 = vand.u32 (!%p740_p5), 127, %v509_v36  ;;  %506 = vst.msk [vmem:[#allocation2] sm:$0x3f] (!%p740_p5), %vm505_vm5, %v1188_v42 }
  0xab   : > { %802 = vmatprep.subr.bf16.mxu0 %v1184_v1  ;;  %v811_v17 = vpack.c.bf16 %v359_v16, %v358_v15  ;;  %v815_v20 = vpack.c.bf16 %v361_v19, %v360_v18  ;;  %v362_v21 = vld [vmem:[#allocation7 + $0x50] sm:$0xff]  ;;  %v363_v22 = vld [vmem:[#allocation7 + $0x58] sm:$0xff]  ;;  %v364_v24 = vld [vmem:[#allocation7 + $0x60] sm:$0xff]  ;;  %507 = vst.msk [vmem:[#allocation3] sm:$0x3f] (!%p740_p5), %vm505_vm5, %v1188_v42 }
  0xac   : > { %v819_v23 = vpack.c.bf16 %v363_v22, %v362_v21  ;;  %v365_v25 = vld [vmem:[#allocation7 + $0x68] sm:$0xff]  ;;  %v366_v27 = vld [vmem:[#allocation7 + $0x70] sm:$0xff]  ;;  %v367_v28 = vld [vmem:[#allocation7 + $0x78] sm:$0xff]  ;;  %vm513_vm4 = vcmp.lt.s32.totalorder (!%p740_p5), %v510_v37, 8 }
  0xad   : > { %v823_v26 = vpack.c.bf16 %v365_v25, %v364_v24  ;;  %v827_v29 = vpack.c.bf16 %v367_v28, %v366_v27  ;;  %v351_v30 = vld [vmem:[#allocation10] sm:$0x3f]  ;;  %v540_v57 = vld [vmem:[#allocation13] sm:$0x3f] (!%p740_p5)  ;;  %v548_v61 = vld [vmem:[#allocation15] sm:$0x3f] (!%p740_p5) }
  0xae   : > { %v544_v59 = vld [vmem:[#allocation16] sm:$0x3f] (!%p740_p5)  ;;  %v559_v9 = vld [vmem:[#allocation6] sm:$0x1] (!%p740_p5) }
  0xaf   : > { %v547_v0 = vld [vmem:[#allocation16] sm:$0x3f] (!%p740_p5) }
  0xb1   : > { %v515_v43 = vld [vmem:[#allocation2] sm:$0x3f] (!%p740_p5) }
  0xb2   : > { %805 = vmatpush3.bf16.xpose.msk.msra.mxu0 %vm1431_vm2, %v803_v11  ;;  %v523_v46 = vld [vmem:[#allocation3] sm:$0x3f] (!%p740_p5) }
  0xb3   : > { %806 = vmatprep.subr.bf16.mxu0 %v1184_v1 }
  0xba   : > { %809 = vmatpush3.bf16.xpose.msk.msra.mxu0 %vm1431_vm2, %v807_v14 }
  0xbb   : > { %810 = vmatprep.subr.bf16.mxu0 %v1184_v1 }
  0xc2   : > { %813 = vmatpush3.bf16.xpose.msk.msra.mxu0 %vm1431_vm2, %v811_v17 }
  0xc3   : > { %814 = vmatprep.subr.bf16.mxu0 %v1184_v1 }
  0xca   : > { %817 = vmatpush3.bf16.xpose.msk.msra.mxu0 %vm1431_vm2, %v815_v20 }
  0xcb   : > { %818 = vmatprep.subr.bf16.mxu0 %v1184_v1 }
  0xd2   : > { %821 = vmatpush3.bf16.xpose.msk.msra.mxu0 %vm1431_vm2, %v819_v23 }
  0xd3   : > { %822 = vmatprep.subr.bf16.mxu0 %v1184_v1 }
  0xda   : > { %825 = vmatpush3.bf16.xpose.msk.msra.mxu0 %vm1431_vm2, %v823_v26 }
  0xdb   : > { %826 = vmatprep.subr.bf16.mxu0 %v1184_v1 }
  0xe2   : > { %829 = vmatpush3.bf16.xpose.msk.msra.mxu0 %vm1431_vm2, %v827_v29 }
  0xe9   : > { %796 = vmatmul.mubr.msk.f32.vlgmr.msra.gmra.mrb[0].mxu0 %vm374_vm1, %v351_v30 }
 0x128   : > { %v372_v31 = vpop.permute.xlu0 %371 }
 0x1b9   : > { %500 = sbr.rel (%p740_p5) target bundleno = 650 (0x28a), region = 76 }
 0x1bc   : > { %v492_v32 = vpop.f32.mrb[0].mxu0 }
 0x1bd   : > { %v1452_v33 = vadd.f32 %v492_v32, %v372_v31  ;;  %v797_v34 = vpop.f32.mrb[1].mxu0 }
 0x1bf   : > { %v496_v35 = vmax.f32 %v1452_v33, 0.0 }
 0x1c1   : > { %v514_v38 = vsel %vm513_vm4, %v496_v35, 0.0 }
 0x1c2   : > { %v517_v39 = vsel %vm516_vm3, %v514_v38, 0.0  ;;  %v524_v40 = vmul.f32 %v514_v38, %v514_v38 }
 0x1c3   : > { %518 = vadd.xlane.f32.xlu0 %v517_v39 }
 0x1c4   : > { %v525_v41 = vsel %vm516_vm3, %v524_v40, 0.0 }
 0x1c7   : > { %526 = vadd.xlane.f32.xlu0 %v525_v41 }
 0x250   : > { %v519_v44 = vpop.xlane.xlu0 %518 }
 0x251   : > { %v520_v45 = vadd.f32 %v519_v44, %v515_v43 }
 0x253   : > { %522 = vst.msk [vmem:[#allocation2] sm:$0x3f] %vm505_vm5, %v520_v45 }
 0x254   : > { %v527_v47 = vpop.xlane.xlu0 %526 }
 0x255   : > { %v528_v48 = vadd.f32 %v527_v47, %v523_v46 }
 0x257   : > { %529 = vst.msk [vmem:[#allocation3] sm:$0x3f] %vm505_vm5, %v528_v48 }
 0x25a   : > { %v533_v49 = vld [vmem:[#allocation2] sm:$0x3f] }
 0x25b   : > { %v534_v50 = vmul.f32 0.125, %v533_v49 }
 0x25d   : > { %v537_v52 = vmul.f32 %v534_v50, %v534_v50 }
 0x25e   : > { %v535_v51 = vld [vmem:[#allocation3] sm:$0x3f] }
 0x25f   : > { %v536_v53 = vmul.f32 0.125, %v535_v51 }
 0x261   : > { %v538_v54 = vsub.f32 %v536_v53, %v537_v52 }
 0x263   : > { %v539_v55 = vmax.f32 %v538_v54, 0.0 }
 0x265   : > { %v541_v56 = vadd.f32 1e-05, %v539_v55 }
 0x267   : > { %931 = vrsqrt.f32 %v541_v56 }
 0x271   : > { %v932_v58 = vpop.eup %931 }
 0x272   : > { %v543_v60 = vmul.f32 %v932_v58, %v540_v57 }
 0x274   : > { %v545_v62 = vmul.f32 %v544_v59, %v543_v60  ;;  %v549_v63 = vmul.f32 %v543_v60, %v534_v50 }
 0x276   : > { %546 = vst.msk [vmem:[#allocation4] sm:$0x3f] %vm505_vm5, %v545_v62  ;;  %v550_v1 = vsub.f32 %v548_v61, %v549_v63 }
 0x278   : > { %v551_v2 = vmul.f32 %v550_v1, %v547_v0 }
 0x27a   : > { %v552_v3 = vsel %vm505_vm5, %v551_v2, 0.0 }
 0x27b   : > { %v553_v4 = vrot.slane %v552_v3, 4 }
 0x27d   : > { %v554_v5 = vadd.f32 %v553_v4, %v552_v3 }
 0x27f   : > { %v555_v6 = vrot.slane %v554_v5, 2 }
 0x281   : > { %v556_v7 = vadd.f32 %v555_v6, %v554_v5 }
 0x283   : > { %v557_v8 = vrot.slane %v556_v7, 1 }
 0x285   : > { %v558_v10 = vadd.f32 %v557_v8, %v556_v7 }
 0x287   : > { %v560_v11 = vadd.f32 %v559_v9, %v558_v10 }
 0x289   : > { %562 = vst.msk [vmem:[#allocation5] sm:$0x1] %vm561_vm6, %v560_v11 }
 0x28a PF: > { %p741_p8 = scmp.ne.s32.totalorder %s1166_s26, 1 }
 0x28b   : > { %v567_v12 = vld [vmem:[#allocation4] sm:$0x3f] (!%p741_p8)  ;;  %v1189_v13 = vmov (!%p741_p8), 0   ;;  %vm574_vm7 = vcmask (!%p741_p8), 1045504   ;;  %v588_v17 = vlaneseq (!%p741_p8) }
 0x28c   : > { %566 = sbr.rel (%p741_p8) target bundleno = 827 (0x33b), region = 88  ;;  %933 = vset.pattern.permute.xlu0 (!%p741_p8), %v1189_v13 }
 0x28d   : > { %570 = vperm.xlu0 (!%p741_p8), %933, %v567_v12   ;;  %v589_v21 = vshrl.u32 (!%p741_p8), %v588_v17, 7 }
 0x28f   : > { %v590_v24 = vsub.s32 (!%p741_p8), 0, %v589_v21 }
 0x290   : > { %v582_v14 = vld [vmem:[#allocation5] sm:$0x1] (!%p741_p8) }
 0x291   : > { %585 = vperm.xlu0 (!%p741_p8), %933, %v582_v14  }
 0x30c   : > { %v571_v15 = vpop.permute.xlu0 %570 }
 0x30d   : > { %v573_v16 = vmul.f32 %v571_v15, %v496_v35 }
 0x30f   : > { %v575_v18 = vsel %vm574_vm7, %v573_v16, 0.0 }
 0x310   : > { %v576_v19 = vrot.slane %v575_v18, 4  ;;  %v586_v25 = vpop.permute.xlu0 %585 }
 0x311   : > { %v591_v28 = vrot.slane %v586_v25, %v590_v24 }
 0x312   : > { %v577_v20 = vadd.f32 %v576_v19, %v575_v18 }
 0x314   : > { %v578_v22 = vrot.slane %v577_v20, 2 }
 0x316   : > { %v579_v23 = vadd.f32 %v578_v22, %v577_v20 }
 0x318   : > { %v580_v26 = vrot.slane %v579_v23, 1 }
 0x31a   : > { %v581_v27 = vadd.f32 %v580_v26, %v579_v23 }
 0x31c   : > { %v592_v29 = vadd.f32 %v591_v28, %v581_v27 }
 0x31e   : > { %v593_v30 = vsub.f32 0.0, %v592_v29 }
 0x320   : > { %v594_v31 = vmul.f32 1.442695, %v593_v30 }
 0x322   : > { %934 = vpow2.f32 %v594_v31 }
 0x32c   : > { %v935_v32 = vpop.eup %934 }
 0x32d   : > { %v596_v34 = vadd.f32 1.0, %v935_v32 }
 0x32f   : > { %936 = vrcp.f32 %v596_v34 }
 0x339   : > { %v937_v33 = vpop.eup %936 }
 0x33a   : > { %598 = vst [vmem:[#allocation18] sm:$0x1] %v937_v33 }
 0x33b PF: > { %p1469_p3 = scmp.eq.s32.totalorder %s708_s30, 1  ;;  %s1190_s8 = smov [#allocation18]  }
 0x33c   : > { %s608_s9 = sshll.u32 %s1190_s8, 4  ;;  %s609_s9 = int_to_ptr.vmem [resolvable:$true] %s608_s9 }
 0x33d   : > { %s1106_s12 = scalar_lea.vmem %s609_s9, 16  ;;  %s1112_s20 = scalar_lea.vmem %s609_s9, 32 }
 0x33e   : > { %p1107_p6 = scmp.ne.s32.totalorder %s609_s9, %s1106_s12  ;;  %p1113_p12 = scmp.lt.s32.totalorder %s609_s9, %s609_s9 }
 0x33f   : > { %p1114_p13 = scmp.lt.s32.totalorder %s1112_s20, %s1106_s12 }
 0x340   : > { %p1108_p10 = pnand %p1107_p6, %p1469_p3 }
 0x341   : > { %p1115_p0 = por %p1114_p13, %p1113_p12 }
 0x342   : > { %p1109_p11 = pneg %p1108_p10 }
 0x344   : > { %p1116_p1 = pnand %p1115_p0, %p1109_p11 }
 0x346   : > { %1119 = shalt.err (!%p1116_p1)
}
 0x347   : > { %s1120_s11 = scalar_lea.hbm %s1511_s7, 16 }
 0x348   : > { %p1121_p4 = scmp.ne.s32.totalorder %s1511_s7, %s1120_s11  ;;  %p1126_p2 = scmp.lt.u32.totalorder %s1120_s11, %s1511_s7 }
 0x34a   : > { %p1122_p7 = pnand %p1121_p4, %p1469_p3 }
 0x34c   : > { %p1123_p9 = pneg %p1122_p7 }
 0x34e   : > { %p1128_p5 = pnand %p1126_p2, %p1123_p9 }
 0x350   : > { %1131 = shalt.err (!%p1128_p5)
}
 0x351   : > { %855 = dma.vmem_to_hbm [thread:$0]  (%p1469_p3), %s609_s9, 16, %s1511_s7, [#allocation9]  }
 0x352   : > { %1161 = dma.done.wait (%p1469_p3), [#allocation9], 16  }
 0x353   : > { %1163 = vsyncadd (%p1469_p3), [#allocation9], 4294967280 }
 0x354 PF: > { %s24_s28 = sadd.s32 1, %s1174_s28   ;;  %s1526_s26 = smov %s1170_s27 }
 0x355   : > { %p21_p8 = scmp.ge.s32.totalorder %s24_s28, 4   ;;  %s1527_s27 = smov %s1529_s13 }
 0x357   :  { %23 = sbr.rel (!%p21_p8) target bundleno = 9 (0x9), region = 115 }
 0x35e   :  { %621 = vsyncpa [#allocation8], 1 }
 0x35f   :  { %623 = vsyncpa [#allocation8 + $0x1], 1 }
 0x360   :  { %624 = vsyncpa [#allocation11], 1 }
 0x361   :  { %625 = vsyncpa [#allocation14], 1 }
 0x362   :  { %626 = vsyncpa [#allocation17], 1 }
 0x363   :  { %627 = vsyncpa [#allocation9], 1 }
 0x364   :  { %629 = vsyncpa [#allocation9 + $0x1], 1 }

</bundles_post_ra>
